<compile_context>
chip_gen: v7x
topology: tpu7x:2x2x1
jax: 0.10.0
libtpu: 0.0.40
codegen_flags: <defaults>
</compile_context>

<pallas_src>
import functools

import jax
import jax.numpy as jnp
from jax import lax
from jax.experimental import pallas as pl
from jax.experimental.pallas import tpu as pltpu

_LANES = 128
_SUBLANES = 8
_MAX_TILE_ROWS = 8192   # 8192 * 128 * 4 B = 4 MiB per f32 input block
_NUM_SPLITS = 2         # leading "parallel" axis (2 TensorCores on v7x)


def _mse_partial_kernel(x_ref, t_ref, o_ref, acc_ref, *,
                        tile_rows, steps_per_split, rows_total, needs_mask):
    c = pl.program_id(0)   # split (core) index
    i = pl.program_id(1)   # reduction step within the split

    @pl.when(i == 0)
    def _():
        acc_ref[...] = jnp.zeros_like(acc_ref)

    d = x_ref[...].astype(jnp.float32) - t_ref[...].astype(jnp.float32)
    sq = d * d

    if needs_mask:
        # Only the ragged last block and any overhanging (clamped) step of the
        # last split need masking; every full block takes the cheap path.
        block_idx = c * steps_per_split + i          # UNclamped block index
        row0 = block_idx * tile_rows
        is_full = row0 + tile_rows <= rows_total

        @pl.when(is_full)
        def _():
            acc_ref[...] += sq.reshape(-1, _SUBLANES, _LANES).sum(axis=0)

        @pl.when(jnp.logical_not(is_full))
        def _():
            row_idx = lax.broadcasted_iota(jnp.int32, sq.shape, 0) + row0
            masked = jnp.where(row_idx < rows_total, sq, 0.0)
            acc_ref[...] += masked.reshape(-1, _SUBLANES, _LANES).sum(axis=0)
    else:
        # Grid tiles the array exactly: no mask code emitted at all.
        acc_ref[...] += sq.reshape(-1, _SUBLANES, _LANES).sum(axis=0)

    @pl.when(i == pl.num_programs(1) - 1)
    def _():
        o_ref[...] = acc_ref[...].reshape(1, _SUBLANES, _LANES)


@jax.jit
def dmcnn_loss(x, target):
    """Equivalent of dmcnnLoss.forward: mean((x - target)**2)."""
    assert x.shape == target.shape, "MSELoss requires matching shapes"
    n = x.size

    xf = jnp.ravel(x)
    tf = jnp.ravel(target)

    # Minimal pad (< 1024 elements) only when the element count is not a
    # multiple of one (8, 128) row-group.  Padded zeros contribute (0-0)^2 = 0.
    # The demo shapes never take this branch.
    pad = (-n) % (_SUBLANES * _LANES)
    if pad:
        xf = jnp.pad(xf, (0, pad))
        tf = jnp.pad(tf, (0, pad))

    rows = (n + pad) // _LANES                      # multiple of 8
    x2 = xf.reshape(rows, _LANES)
    t2 = tf.reshape(rows, _LANES)

    tile_rows = min(_MAX_TILE_ROWS, rows)           # never exceeds the array
    num_blocks = (rows + tile_rows - 1) // tile_rows
    num_splits = min(_NUM_SPLITS, num_blocks)
    steps_per_split = (num_blocks + num_splits - 1) // num_splits
    last_block = num_blocks - 1

    # Mask is only needed when the grid does not tile the rows exactly.
    needs_mask = (num_blocks * tile_rows != rows) or \
                 (num_splits * steps_per_split != num_blocks)

    def in_index_map(c, i):
        # Clamp so an overhanging step of the last split re-reads the final
        # valid block; its contribution is zeroed by the in-kernel row mask.
        return (jnp.minimum(c * steps_per_split + i, last_block), 0)

    kernel = functools.partial(
        _mse_partial_kernel,
        tile_rows=tile_rows,
        steps_per_split=steps_per_split,
        rows_total=rows,
        needs_mask=needs_mask,
    )

    partials = pl.pallas_call(
        kernel,
        out_shape=jax.ShapeDtypeStruct((num_splits, _SUBLANES, _LANES),
                                       jnp.float32),
        grid_spec=pltpu.PrefetchScalarGridSpec(
            num_scalar_prefetch=0,
            grid=(num_splits, steps_per_split),
            in_specs=[
                pl.BlockSpec((tile_rows, _LANES), in_index_map),
                pl.BlockSpec((tile_rows, _LANES), in_index_map),
            ],
            out_specs=pl.BlockSpec((1, _SUBLANES, _LANES),
                                   lambda c, i: (c, 0, 0)),
            scratch_shapes=[pltpu.VMEM((_SUBLANES, _LANES), jnp.float32)],
        ),
        compiler_params=pltpu.CompilerParams(
            dimension_semantics=("parallel", "arbitrary"),
            vmem_limit_bytes=32 * 1024 * 1024,
        ),
    )(x2, t2)

    # Single tiny final reduce + 1/N scale (true element count, not padded).
    return jnp.sum(partials) / n


if __name__ == "__main__":
    key = jax.random.PRNGKey(0)
    kx, kt = jax.random.split(key)

    # Small NCHW-like prediction / target pair, as the DMCNN model produces.
    x = jax.random.normal(kx, (2, 4, 16, 16), dtype=jnp.float32)
    target = jax.random.normal(kt, (2, 4, 16, 16), dtype=jnp.float32)

    loss = dmcnn_loss(x, target)
    jax.block_until_ready(loss)
    ref = jnp.mean((x - target) ** 2)
    assert jnp.allclose(loss, ref, rtol=1e-5, atol=1e-6), (loss, ref)

    # Extra correctness checks for the tiled / masked / multi-split paths.
    # (a) single large block, no mask.
    kx2, kt2 = jax.random.split(jax.random.PRNGKey(1))
    x2 = jax.random.normal(kx2, (2, 4, 320, 320), dtype=jnp.float32)
    t2 = jax.random.normal(kt2, (2, 4, 320, 320), dtype=jnp.float32)
    loss2 = dmcnn_loss(x2, t2)
    jax.block_until_ready(loss2)
    ref2 = jnp.mean((x2 - t2) ** 2)
    assert jnp.allclose(loss2, ref2, rtol=1e-5, atol=1e-6), (loss2, ref2)

    # (b) multiple blocks, 2 splits, ragged tail + overhanging split step.
    kx3, kt3 = jax.random.split(jax.random.PRNGKey(2))
    x3 = jax.random.normal(kx3, (3, 4, 480, 512), dtype=jnp.float32)
    t3 = jax.random.normal(kt3, (3, 4, 480, 512), dtype=jnp.float32)
    loss3 = dmcnn_loss(x3, t3)
    jax.block_until_ready(loss3)
    ref3 = jnp.mean((x3 - t3) ** 2)
    assert jnp.allclose(loss3, ref3, rtol=1e-5, atol=1e-6), (loss3, ref3)

    # (c) element count not a multiple of 1024 (pad path).
    kx4, kt4 = jax.random.split(jax.random.PRNGKey(3))
    x4 = jax.random.normal(kx4, (2, 3, 17), dtype=jnp.float32)
    t4 = jax.random.normal(kt4, (2, 3, 17), dtype=jnp.float32)
    loss4 = dmcnn_loss(x4, t4)
    jax.block_until_ready(loss4)
    ref4 = jnp.mean((x4 - t4) ** 2)
    assert jnp.allclose(loss4, ref4, rtol=1e-5, atol=1e-6), (loss4, ref4)

    print("KERNEL_OK")
</pallas_src>

<mosaic_0001>
module attributes {stable_mosaic.version = 11 : i64} {
  func.func @_mse_partial_kernel(%arg0: i32, %arg1: i32, %arg2: memref<16x128xf32, #tpu.memory_space<vmem>>, %arg3: memref<16x128xf32, #tpu.memory_space<vmem>>, %arg4: memref<1x8x128xf32, #tpu.memory_space<vmem>>, %arg5: memref<8x128xf32, #tpu.memory_space<vmem>>) attributes {dimension_semantics = [#tpu.dimension_semantics<parallel>, #tpu.dimension_semantics<arbitrary>], iteration_bounds = array<i64: 1, 1>, scalar_prefetch = 0 : i64, scratch_operands = 1 : i64, tpu.core_type = #tpu.core_type<tc>, window_params = [{transform_indices = @transform_0, window_bounds = array<i64: 16, 128>}, {transform_indices = @transform_1, window_bounds = array<i64: 16, 128>}, {transform_indices = @transform_2, window_bounds = array<i64: 1, 8, 128>}]} {
    %c0_i32 = arith.constant 0 : i32
    %0 = arith.cmpi eq, %arg1, %c0_i32 : i32
    %1 = arith.extui %0 : i1 to i32
    %c0_i32_0 = arith.constant 0 : i32
    %2 = arith.cmpi ne, %1, %c0_i32_0 : i32
    scf.if %2 {
      %cst_10 = arith.constant 0.000000e+00 : f32
      %15 = vector.broadcast %cst_10 : f32 to vector<8x128xf32>
      %c0_11 = arith.constant 0 : index
      %c0_12 = arith.constant 0 : index
      %16 = vector.load %arg5[%c0_11, %c0_12] : memref<8x128xf32, #tpu.memory_space<vmem>>, vector<8x128xf32>
      tpu.vector_store %arg5[%c0_11, %c0_12], %15 {strides = array<i32>} : memref<8x128xf32, #tpu.memory_space<vmem>>, vector<8x128xf32>,
    } else {
    }
    %c0 = arith.constant 0 : index
    %c0_1 = arith.constant 0 : index
    %3 = vector.load %arg2[%c0, %c0_1] : memref<16x128xf32, #tpu.memory_space<vmem>>, vector<16x128xf32>
    %c0_2 = arith.constant 0 : index
    %c0_3 = arith.constant 0 : index
    %4 = vector.load %arg3[%c0_2, %c0_3] : memref<16x128xf32, #tpu.memory_space<vmem>>, vector<16x128xf32>
    %5 = arith.subf %3, %4 : vector<16x128xf32>
    %6 = arith.mulf %5, %5 : vector<16x128xf32>
    %c0_4 = arith.constant 0 : index
    %c0_5 = arith.constant 0 : index
    %7 = vector.load %arg5[%c0_4, %c0_5] : memref<8x128xf32, #tpu.memory_space<vmem>>, vector<8x128xf32>
    %8 = vector.shape_cast %6 : vector<16x128xf32> to vector<2x8x128xf32>
    %cst = arith.constant dense<0.000000e+00> : vector<8x128xf32>
    %9 = vector.multi_reduction <add>, %8, %cst [0] : vector<2x8x128xf32> to vector<8x128xf32>
    %10 = arith.addf %7, %9 : vector<8x128xf32>
    %c0_6 = arith.constant 0 : index
    %c0_7 = arith.constant 0 : index
    %11 = vector.load %arg5[%c0_6, %c0_7] : memref<8x128xf32, #tpu.memory_space<vmem>>, vector<8x128xf32>
    tpu.vector_store %arg5[%c0_6, %c0_7], %10 {strides = array<i32>} : memref<8x128xf32, #tpu.memory_space<vmem>>, vector<8x128xf32>,
    %c0_i32_8 = arith.constant 0 : i32
    %12 = arith.cmpi eq, %arg1, %c0_i32_8 : i32
    %13 = arith.extui %12 : i1 to i32
    %c0_i32_9 = arith.constant 0 : i32
    %14 = arith.cmpi ne, %13, %c0_i32_9 : i32
    scf.if %14 {
      %c0_10 = arith.constant 0 : index
      %c0_11 = arith.constant 0 : index
      %15 = vector.load %arg5[%c0_10, %c0_11] : memref<8x128xf32, #tpu.memory_space<vmem>>, vector<8x128xf32>
      %16 = vector.shape_cast %15 : vector<8x128xf32> to vector<1x8x128xf32>
      %c0_12 = arith.constant 0 : index
      %c0_13 = arith.constant 0 : index
      %c0_14 = arith.constant 0 : index
      %17 = vector.load %arg4[%c0_12, %c0_13, %c0_14] : memref<1x8x128xf32, #tpu.memory_space<vmem>>, vector<1x8x128xf32>
      tpu.vector_store %arg4[%c0_12, %c0_13, %c0_14], %16 {strides = array<i32>} : memref<1x8x128xf32, #tpu.memory_space<vmem>>, vector<1x8x128xf32>,
    } else {
    }
    return
  }
  func.func @transform_0(%arg0: i32, %arg1: i32) -> (i32, i32) {
    %c1_i32 = arith.constant 1 : i32
    %0 = arith.muli %arg0, %c1_i32 : i32
    %1 = arith.addi %0, %arg1 : i32
    %c0_i32 = arith.constant 0 : i32
    %2 = arith.minsi %1, %c0_i32 : i32
    %c0_i32_0 = arith.constant 0 : i32
    %c0_i32_1 = arith.constant 0 : i32
    return %2, %c0_i32_0 : i32, i32
  }
  func.func @transform_1(%arg0: i32, %arg1: i32) -> (i32, i32) {
    %c1_i32 = arith.constant 1 : i32
    %0 = arith.muli %arg0, %c1_i32 : i32
    %1 = arith.addi %0, %arg1 : i32
    %c0_i32 = arith.constant 0 : i32
    %2 = arith.minsi %1, %c0_i32 : i32
    %c0_i32_0 = arith.constant 0 : i32
    %c0_i32_1 = arith.constant 0 : i32
    return %2, %c0_i32_0 : i32, i32
  }
  func.func @transform_2(%arg0: i32, %arg1: i32) -> (i32, i32, i32) {
    %c0_i32 = arith.constant 0 : i32
    %c0_i32_0 = arith.constant 0 : i32
    %c0_i32_1 = arith.constant 0 : i32
    return %arg0, %c0_i32, %c0_i32_0 : i32, i32, i32
  }
}

</mosaic_0001>

<bundles_post_ra>
// kernel: dmcnn_loss.1
= control target key start
LH: loop header
LB: loop body
LE: loop exit
PB: predicated region body
PF: predicated region fallthrough
CT: control target
= control target key end

     0   :  { %s143_s0 = inlined_call_operand.vmem [shape: f32[16,128], index: 0, kind: input, shape index: {}]   ;;  %s144_s1 = inlined_call_operand.vmem [shape: f32[16,128], index: 1, kind: input, shape index: {}]   ;;  %s145_s2 = inlined_call_operand.vmem [shape: f32[1,8,128], index: 2, kind: output, shape index: {}]  }
   0x1   :  { %v80_v0 = vld [vmem:[%s143_s0] sm:$0xff]  ;;  %v81_v1 = vld [vmem:[%s143_s0 + $0x8] sm:$0xff] }
   0x2   :  { %v82_v2 = vld [vmem:[%s144_s1] sm:$0xff]  ;;  %v83_v3 = vld [vmem:[%s144_s1 + $0x8] sm:$0xff] }
   0x3   :  { %v84_v4 = vsub.f32 %v80_v0, %v82_v2  ;;  %v85_v5 = vsub.f32 %v81_v1, %v83_v3 }
   0x5   :  { %v86_v6 = vmul.f32 %v84_v4, %v84_v4  ;;  %v87_v7 = vmul.f32 %v85_v5, %v85_v5 }
   0x7   :  { %v89_v8 = vadd.f32 %v87_v7, %v86_v6 }
   0x9   :  { %96 = vst [vmem:[%s145_s2] sm:$0xff] %v89_v8 }

</bundles_post_ra>
